<compile_context>
chip_gen: v7x
topology: tpu7x:2x2x1
jax: 0.10.0
libtpu: 0.0.40
codegen_flags: <defaults>
</compile_context>

<pallas_src>
import math

import jax
import jax.numpy as jnp
from jax.experimental import pallas as pl
from jax.experimental.pallas import tpu as pltpu


def generator_kernel(x_ref, w_ref, o_ref):
    # x_ref: [tm, E] row tile, w_ref: [V, E] full weight (resident,
    # single-buffered), o_ref: [tm, V] log-prob tile.
    # Contract on E of both operands (== x @ W.T); no transpose materialized.
    logits = jax.lax.dot_general(
        x_ref[...],
        w_ref[...],
        dimension_numbers=(((1,), (1,)), ((), ())),
        preferred_element_type=jnp.float32,
    )
    # Numerically stable log_softmax over the full vocab (lane) axis, in f32.
    m = jnp.max(logits, axis=-1, keepdims=True)
    shifted = logits - m
    lse = jnp.log(jnp.sum(jnp.exp(shifted), axis=-1, keepdims=True))
    o_ref[...] = (shifted - lse).astype(o_ref.dtype)


def _weight_spec(V, E, single_buffer):
    """Weight index_map is constant across the grid -> one VMEM copy suffices."""
    if single_buffer:
        try:
            return pl.BlockSpec((V, E), lambda i: (0, 0),
                                pipeline_mode=pl.Buffered(1))
        except (TypeError, AttributeError):
            pass
    return pl.BlockSpec((V, E), lambda i: (0, 0))


def generator_forward(x, weight, *, tm=256, compute_dtype=jnp.bfloat16,
                      out_dtype=None):
    """x: [B, S, E]; weight: [V, E] (PyTorch nn.Linear layout, no transpose needed)."""
    B, S, E = x.shape
    V, E_w = weight.shape
    assert E == E_w, "weight must be [vocab, embed]"
    M = B * S
    out_dtype = jnp.dtype(out_dtype) if out_dtype is not None else x.dtype

    # Row tile: large (feeds full MXU tile heights, amortizes per-step
    # overhead) but never larger than the 8-rounded row count, so toy shapes
    # run as a single grid step.
    tm = max(8, min(tm, pl.cdiv(M, 8) * 8))
    m_pad = pl.cdiv(M, tm) * tm

    # bf16 inputs to the MXU (f32 accumulation in-kernel). NOTE: in production
    # store the weight in compute_dtype so this cast (a weight-sized HBM round
    # trip) disappears from the per-call path.
    x2d = x.reshape(M, E).astype(compute_dtype)
    if m_pad != M:
        x2d = jnp.pad(x2d, ((0, m_pad - M), (0, 0)))
    w = weight.astype(compute_dtype)

    # VMEM budget: 1x weight + 2x x-tile + 2x out-tile + f32 logits, +headroom.
    cb = jnp.dtype(compute_dtype).itemsize
    need = (V * E * cb
            + 2 * tm * E * cb
            + 2 * tm * V * out_dtype.itemsize
            + tm * V * 4)
    vmem_limit = int(min(100 * 2**20, max(16 * 2**20, 1.5 * need + 2**20)))

    def run(single_buffer_weight):
        return pl.pallas_call(
            generator_kernel,
            out_shape=jax.ShapeDtypeStruct((m_pad, V), out_dtype),
            grid_spec=pltpu.PrefetchScalarGridSpec(
                num_scalar_prefetch=0,
                grid=(m_pad // tm,),
                in_specs=[
                    pl.BlockSpec((tm, E), lambda i: (i, 0)),   # row tile of x
                    _weight_spec(V, E, single_buffer_weight),  # resident weight
                ],
                out_specs=pl.BlockSpec((tm, V), lambda i: (i, 0)),
            ),
            compiler_params=pltpu.CompilerParams(
                dimension_semantics=("parallel",),
                vmem_limit_bytes=vmem_limit,
            ),
        )(x2d, w)

    try:
        out2d = run(single_buffer_weight=True)
    except Exception:  # fallback if single-buffer hint is unsupported
        out2d = run(single_buffer_weight=False)

    return out2d[:M].reshape(B, S, V)


if __name__ == "__main__":
    # Small shapes consistent with the module: embed_dim=32, vocab=128,
    # batch=2, seq=8.
    B, S, E, V = 2, 8, 32, 128

    key = jax.random.PRNGKey(0)
    kx, kw = jax.random.split(key)

    x = jax.random.normal(kx, (B, S, E), dtype=jnp.float32)
    # nn.Linear default init: U(-1/sqrt(E), 1/sqrt(E)), shape [V, E].
    bound = 1.0 / math.sqrt(E)
    weight = jax.random.uniform(kw, (V, E), dtype=jnp.float32,
                                minval=-bound, maxval=bound)

    out = generator_forward(x, weight)
    out = jax.block_until_ready(out)
    assert out.shape == (B, S, V)

    # Loose check vs the pure-f32 reference (kernel matmul runs on bf16 MXU
    # inputs with f32 accumulation).
    ref_f32 = jax.nn.log_softmax(x @ weight.T, axis=-1)
    assert float(jnp.max(jnp.abs(out - ref_f32))) < 5e-2, "mismatch vs f32 reference"

    # Tight check vs a reference fed the same bf16-rounded inputs.
    xb = x.astype(jnp.bfloat16).astype(jnp.float32)
    wb = weight.astype(jnp.bfloat16).astype(jnp.float32)
    ref_bf16 = jax.nn.log_softmax(xb @ wb.T, axis=-1)
    assert jnp.allclose(out, ref_bf16, atol=1e-4, rtol=1e-4), \
        "mismatch vs bf16-matched reference"

    print("KERNEL_OK")
</pallas_src>

<mosaic_0001>
module attributes {stable_mosaic.version = 11 : i64} {
  func.func @generator_kernel(%arg0: i32, %arg1: memref<16x32xbf16, #tpu.memory_space<vmem>>, %arg2: memref<128x32xbf16, #tpu.memory_space<vmem>>, %arg3: memref<16x128xf32, #tpu.memory_space<vmem>>) attributes {dimension_semantics = [#tpu.dimension_semantics<parallel>], iteration_bounds = array<i64: 1>, scalar_prefetch = 0 : i64, scratch_operands = 0 : i64, tpu.core_type = #tpu.core_type<tc>, window_params = [{transform_indices = @transform_0, window_bounds = array<i64: 16, 32>}, {pipeline_mode = #tpu.pipeline_mode<synchronous>, transform_indices = @transform_1, window_bounds = array<i64: 128, 32>}, {transform_indices = @transform_2, window_bounds = array<i64: 16, 128>}]} {
    %c0 = arith.constant 0 : index
    %c0_0 = arith.constant 0 : index
    %0 = vector.load %arg1[%c0, %c0_0] : memref<16x32xbf16, #tpu.memory_space<vmem>>, vector<16x32xbf16>
    %c0_1 = arith.constant 0 : index
    %c0_2 = arith.constant 0 : index
    %1 = vector.load %arg2[%c0_1, %c0_2] : memref<128x32xbf16, #tpu.memory_space<vmem>>, vector<128x32xbf16>
    %cst = arith.constant dense<0.000000e+00> : vector<16x128xf32>
    %2 = tpu.matmul %0, %1, %cst {dimension_numbers = #tpu.dot_dimension_numbers<[1], [1], [0], [0], [0, 0, 1, 0], [], []>} : vector<16x32xbf16>, vector<128x32xbf16>, vector<16x128xf32> -> vector<16x128xf32>
    %cst_3 = arith.constant dense<0xFF800000> : vector<16xf32>
    %3 = vector.multi_reduction <maximumf>, %2, %cst_3 [1] : vector<16x128xf32> to vector<16xf32>
    %4 = vector.shape_cast %3 : vector<16xf32> to vector<16x1xf32>
    %5 = vector.broadcast %4 : vector<16x1xf32> to vector<16x128xf32>
    %6 = arith.subf %2, %5 : vector<16x128xf32>
    %7 = math.exp %6 : vector<16x128xf32>
    %cst_4 = arith.constant dense<0.000000e+00> : vector<16xf32>
    %8 = vector.multi_reduction <add>, %7, %cst_4 [1] : vector<16x128xf32> to vector<16xf32>
    %9 = vector.shape_cast %8 : vector<16xf32> to vector<16x1xf32>
    %10 = math.log %9 : vector<16x1xf32>
    %11 = vector.broadcast %10 : vector<16x1xf32> to vector<16x128xf32>
    %12 = arith.subf %6, %11 : vector<16x128xf32>
    %c0_5 = arith.constant 0 : index
    %c0_6 = arith.constant 0 : index
    %13 = vector.load %arg3[%c0_5, %c0_6] : memref<16x128xf32, #tpu.memory_space<vmem>>, vector<16x128xf32>
    tpu.vector_store %arg3[%c0_5, %c0_6], %12 {strides = array<i32>} : memref<16x128xf32, #tpu.memory_space<vmem>>, vector<16x128xf32>,
    return
  }
  func.func @transform_0(%arg0: i32) -> (i32, i32) {
    %c0_i32 = arith.constant 0 : i32
    %c0_i32_0 = arith.constant 0 : i32
    return %arg0, %c0_i32 : i32, i32
  }
  func.func @transform_1(%arg0: i32) -> (i32, i32) {
    %c0_i32 = arith.constant 0 : i32
    %c0_i32_0 = arith.constant 0 : i32
    %c0_i32_1 = arith.constant 0 : i32
    return %c0_i32, %c0_i32_0 : i32, i32
  }
  func.func @transform_2(%arg0: i32) -> (i32, i32) {
    %c0_i32 = arith.constant 0 : i32
    %c0_i32_0 = arith.constant 0 : i32
    return %arg0, %c0_i32 : i32, i32
  }
}

module attributes {stable_mosaic.version = 11 : i64} {
  func.func @generator_kernel(%arg0: i32, %arg1: memref<16x32xbf16, #tpu.memory_space<vmem>>, %arg2: memref<128x32xbf16, #tpu.memory_space<vmem>>, %arg3: memref<16x128xf32, #tpu.memory_space<vmem>>) attributes {dimension_semantics = [#tpu.dimension_semantics<parallel>], iteration_bounds = array<i64: 1>, scalar_prefetch = 0 : i64, scratch_operands = 0 : i64, tpu.core_type = #tpu.core_type<tc>, window_params = [{transform_indices = @transform_0, window_bounds = array<i64: 16, 32>}, {pipeline_mode = #tpu.pipeline_mode<synchronous>, transform_indices = @transform_1, window_bounds = array<i64: 128, 32>}, {transform_indices = @transform_2, window_bounds = array<i64: 16, 128>}]} {
    %c0 = arith.constant 0 : index
    %c0_0 = arith.constant 0 : index
    %0 = vector.load %arg1[%c0, %c0_0] : memref<16x32xbf16, #tpu.memory_space<vmem>>, vector<16x32xbf16>
    %c0_1 = arith.constant 0 : index
    %c0_2 = arith.constant 0 : index
    %1 = vector.load %arg2[%c0_1, %c0_2] : memref<128x32xbf16, #tpu.memory_space<vmem>>, vector<128x32xbf16>
    %cst = arith.constant dense<0.000000e+00> : vector<16x128xf32>
    %2 = tpu.matmul %0, %1, %cst {dimension_numbers = #tpu.dot_dimension_numbers<[1], [1], [0], [0], [0, 0, 1, 0], [], []>} : vector<16x32xbf16>, vector<128x32xbf16>, vector<16x128xf32> -> vector<16x128xf32>
    %cst_3 = arith.constant dense<0xFF800000> : vector<16xf32>
    %3 = vector.multi_reduction <maximumf>, %2, %cst_3 [1] : vector<16x128xf32> to vector<16xf32>
    %4 = vector.shape_cast %3 : vector<16xf32> to vector<16x1xf32>
    %5 = vector.broadcast %4 : vector<16x1xf32> to vector<16x128xf32>
    %6 = arith.subf %2, %5 : vector<16x128xf32>
    %7 = math.exp %6 : vector<16x128xf32>
    %cst_4 = arith.constant dense<0.000000e+00> : vector<16xf32>
    %8 = vector.multi_reduction <add>, %7, %cst_4 [1] : vector<16x128xf32> to vector<16xf32>
    %9 = vector.shape_cast %8 : vector<16xf32> to vector<16x1xf32>
    %10 = math.log %9 : vector<16x1xf32>
    %11 = vector.broadcast %10 : vector<16x1xf32> to vector<16x128xf32>
    %12 = arith.subf %6, %11 : vector<16x128xf32>
    %c0_5 = arith.constant 0 : index
    %c0_6 = arith.constant 0 : index
    %13 = vector.load %arg3[%c0_5, %c0_6] : memref<16x128xf32, #tpu.memory_space<vmem>>, vector<16x128xf32>
    tpu.vector_store %arg3[%c0_5, %c0_6], %12 {strides = array<i32>} : memref<16x128xf32, #tpu.memory_space<vmem>>, vector<16x128xf32>,
    return
  }
  func.func @transform_0(%arg0: i32) -> (i32, i32) {
    %c0_i32 = arith.constant 0 : i32
    %c0_i32_0 = arith.constant 0 : i32
    return %arg0, %c0_i32 : i32, i32
  }
  func.func @transform_1(%arg0: i32) -> (i32, i32) {
    %c0_i32 = arith.constant 0 : i32
    %c0_i32_0 = arith.constant 0 : i32
    %c0_i32_1 = arith.constant 0 : i32
    return %c0_i32, %c0_i32_0 : i32, i32
  }
  func.func @transform_2(%arg0: i32) -> (i32, i32) {
    %c0_i32 = arith.constant 0 : i32
    %c0_i32_0 = arith.constant 0 : i32
    return %arg0, %c0_i32 : i32, i32
  }
}

</mosaic_0001>

<bundles_post_ra>
// kernel: tpu_custom_call.1
= control target key start
LH: loop header
LB: loop body
LE: loop exit
PB: predicated region body
PF: predicated region fallthrough
CT: control target
= control target key end

     0   :  { %v268_v1 = vmov 0.0   ;;  %vm76_vm0 = vcmask 261120   ;;  %vm269_vm1 = vmmov 0   ;;  %s336_s0 = inlined_call_operand.vmem [shape: bf16[16,32], index: 0, kind: input, shape index: {}]   ;;  %s337_s1 = inlined_call_operand.vmem [shape: bf16[128,32], index: 1, kind: input, shape index: {}]   ;;  %s338_s2 = inlined_call_operand.hbm [shape: f32[16,128], index: 2, kind: output, shape index: {}]  }
   0x1   :  { %v227_v0 = vld [vmem:[%s337_s1] sm:$0xff]   ;;  %202 = vmatprep.subr.bf16.mxu0 %v268_v1  ;;  %v228_v3 = vld [vmem:[%s337_s1 + $0x8] sm:$0xff]   ;;  %218 = vmatprep.mubr.msk.bf16.mxu0 %vm269_vm1, %v268_v1 }
   0x2   :  { %v81_v2 = vsel %vm76_vm0, %v227_v0, 0  ;;  %v84_v4 = vsel %vm76_vm0, %v228_v3, 0 }
   0x3   :  { %203 = vmatpush3.bf16.xpose.msra.mxu0 %v81_v2 }
   0x4   :  { %204 = vmatprep.subr.bf16.mxu0 %v268_v1 }
   0x5   :  { %7 = vsyncpa [#allocation3], 0  ;;  %v229_v5 = vld [vmem:[%s337_s1 + $0x10] sm:$0xff]   ;;  %v230_v7 = vld [vmem:[%s337_s1 + $0x18] sm:$0xff]  }
   0x6   :  { %v87_v6 = vsel %vm76_vm0, %v229_v5, 0  ;;  %v90_v8 = vsel %vm76_vm0, %v230_v7, 0  ;;  %v231_v9 = vld [vmem:[%s337_s1 + $0x20] sm:$0xff]   ;;  %v232_v11 = vld [vmem:[%s337_s1 + $0x28] sm:$0xff]   ;;  %v233_v13 = vld [vmem:[%s337_s1 + $0x30] sm:$0xff]  }
   0x7   :  { %v93_v10 = vsel %vm76_vm0, %v231_v9, 0  ;;  %v96_v12 = vsel %vm76_vm0, %v232_v11, 0  ;;  %v99_v14 = vsel %vm76_vm0, %v233_v13, 0  ;;  %v234_v15 = vld [vmem:[%s337_s1 + $0x38] sm:$0xff]   ;;  %v235_v17 = vld [vmem:[%s336_s0] sm:$0xff]   ;;  %s270_s0 = smov [#allocation2]  }
   0x8   :  { %v102_v16 = vsel %vm76_vm0, %v234_v15, 0  ;;  %s172_s1 = sshll.u32 %s270_s0, 4  ;;  %s173_s1 = int_to_ptr.vmem [resolvable:$true] %s172_s1 }
   0x9   :  { %s244_s27 = scalar_lea.vmem %s173_s1, 256  ;;  %p249_p1 = scmp.lt.s32.totalorder %s173_s1, %s173_s1 }
   0xa   :  { %p245_p0 = scmp.ne.s32.totalorder %s173_s1, %s244_s27  ;;  %p250_p2 = scmp.lt.s32.totalorder %s244_s27, %s244_s27 }
   0xb   :  { %205 = vmatpush3.bf16.xpose.msra.mxu0 %v84_v4 }
   0xc   :  { %206 = vmatprep.subr.bf16.mxu0 %v268_v1  ;;  %p251_p3 = por %p250_p2, %p249_p1 }
   0xe   :  { %p252_p4 = pnand %p251_p3, %p245_p0 }
  0x13   :  { %207 = vmatpush3.bf16.xpose.msra.mxu0 %v87_v6 }
  0x14   :  { %208 = vmatprep.subr.bf16.mxu0 %v268_v1 }
  0x1b   :  { %209 = vmatpush3.bf16.xpose.msra.mxu0 %v90_v8 }
  0x1c   :  { %210 = vmatprep.subr.bf16.mxu0 %v268_v1 }
  0x23   :  { %211 = vmatpush3.bf16.xpose.msra.mxu0 %v93_v10 }
  0x24   :  { %212 = vmatprep.subr.bf16.mxu0 %v268_v1 }
  0x2b   :  { %213 = vmatpush3.bf16.xpose.msra.mxu0 %v96_v12 }
  0x2c   :  { %214 = vmatprep.subr.bf16.mxu0 %v268_v1 }
  0x33   :  { %215 = vmatpush3.bf16.xpose.msra.mxu0 %v99_v14 }
  0x34   :  { %216 = vmatprep.subr.bf16.mxu0 %v268_v1 }
  0x3b   :  { %217 = vmatpush3.bf16.xpose.msra.mxu0 %v102_v16 }
  0x42   :  { %219 = vmatmul.mubr.msk.bf16.vlgmr.msra.gmra.mrb[0].mxu0 %vm76_vm0, %v235_v17 }
 0x115   :  { %v138_v18 = vpop.f32.mrb[0].mxu0 }
 0x116   :  { %145 = vmax.xlane.f32.xlu0 %v138_v18  ;;  %v220_v19 = vpop.f32.mrb[1].mxu0 }
 0x117   :  { %v141_v20 = vpop.f32.mrb[2].mxu0 }
 0x118   :  { %v221_v21 = vpop.f32.mrb[3].mxu0 }
 0x11a   :  { %147 = vmax.xlane.f32.xlu0 %v141_v20 }
 0x1a3   :  { %v146_v22 = vpop.xlane.xlu0 %145 }
 0x1a4   :  { %v149_v23 = vsub.f32 %v138_v18, %v146_v22 }
 0x1a6   :  { %v151_v24 = vmul.f32 1.442695, %v149_v23 }
 0x1a7   :  { %v148_v25 = vpop.xlane.xlu0 %147 }
 0x1a8   :  { %v150_v26 = vsub.f32 %v141_v20, %v148_v25  ;;  %236 = vpow2.f32 %v151_v24 }
 0x1aa   :  { %v153_v27 = vmul.f32 1.442695, %v150_v26 }
 0x1ac   :  { %238 = vpow2.f32 %v153_v27 }
 0x1b2   :  { %v237_v28 = vpop.eup %236 }
 0x1b3   :  { %155 = vadd.xlane.f32.xlu1 %v237_v28 }
 0x1b6   :  { %v239_v29 = vpop.eup %238 }
 0x1b7   :  { %157 = vadd.xlane.f32.xlu1 %v239_v29 }
 0x240   :  { %v156_v30 = vpop.xlane.xlu1 %155 }
 0x241   :  { %240 = vlog2.f32 %v156_v30 }
 0x244   :  { %v158_v31 = vpop.xlane.xlu1 %157 }
 0x245   :  { %242 = vlog2.f32 %v158_v31 }
 0x24b   :  { %v241_v32 = vpop.eup %240 }
 0x24c   :  { %v160_v33 = vmul.f32 0.6931472, %v241_v32 }
 0x24e   :  { %v163_v34 = vsub.f32 %v149_v23, %v160_v33 }
 0x24f   :  { %v243_v35 = vpop.eup %242 }
 0x250   :  { %165 = vst [vmem:[#allocation2] sm:$0xff] %v163_v34  ;;  %v162_v36 = vmul.f32 0.6931472, %v243_v35 }
 0x252   :  { %v164_v37 = vsub.f32 %v150_v26, %v162_v36 }
 0x254   :  { %166 = vst [vmem:[#allocation2 + $0x8] sm:$0xff] %v164_v37 }
 0x255   :  { %255 = shalt.err (!%p252_p4)
}
 0x256   :  { %s256_s30 = scalar_lea.hbm %s338_s2, 256 }
 0x257   :  { %p257_p5 = scmp.ne.s32.totalorder %s338_s2, %s256_s30  ;;  %p260_p6 = scmp.lt.u32.totalorder %s256_s30, %s338_s2 }
 0x259   :  { %p262_p7 = pnand %p260_p6, %p257_p5 }
 0x25b   :  { %265 = shalt.err (!%p262_p7)
}
 0x25c   :  { %s271_s7 = smov 128   ;;  %s272_s8 = smov 8  }
 0x25d   :  { %178 = dma.vmem_to_hbm [thread:$0]  %s173_s1, 256, %s338_s2, [#allocation3], %s271_s7, %s271_s7, %s272_s8  }
 0x25e   :  { %266 = dma.done.wait [#allocation3], 256  }
 0x25f   :  { %267 = vsyncadd [#allocation3], 4294967040 }
 0x260   :  { %182 = vsyncpa [#allocation3], 1 }

// kernel: tpu_custom_call.1
= control target key start
LH: loop header
LB: loop body
LE: loop exit
PB: predicated region body
PF: predicated region fallthrough
CT: control target
= control target key end

     0   :  { %v268_v1 = vmov 0.0   ;;  %vm76_vm0 = vcmask 261120   ;;  %vm269_vm1 = vmmov 0   ;;  %s336_s0 = inlined_call_operand.vmem [shape: bf16[16,32], index: 0, kind: input, shape index: {}]   ;;  %s337_s1 = inlined_call_operand.vmem [shape: bf16[128,32], index: 1, kind: input, shape index: {}]   ;;  %s338_s2 = inlined_call_operand.hbm [shape: f32[16,128], index: 2, kind: output, shape index: {}]  }
   0x1   :  { %v227_v0 = vld [vmem:[%s337_s1] sm:$0xff]   ;;  %202 = vmatprep.subr.bf16.mxu0 %v268_v1  ;;  %v228_v3 = vld [vmem:[%s337_s1 + $0x8] sm:$0xff]   ;;  %218 = vmatprep.mubr.msk.bf16.mxu0 %vm269_vm1, %v268_v1 }
   0x2   :  { %v81_v2 = vsel %vm76_vm0, %v227_v0, 0  ;;  %v84_v4 = vsel %vm76_vm0, %v228_v3, 0 }
   0x3   :  { %203 = vmatpush3.bf16.xpose.msra.mxu0 %v81_v2 }
   0x4   :  { %204 = vmatprep.subr.bf16.mxu0 %v268_v1 }
   0x5   :  { %7 = vsyncpa [#allocation3], 0  ;;  %v229_v5 = vld [vmem:[%s337_s1 + $0x10] sm:$0xff]   ;;  %v230_v7 = vld [vmem:[%s337_s1 + $0x18] sm:$0xff]  }
   0x6   :  { %v87_v6 = vsel %vm76_vm0, %v229_v5, 0  ;;  %v90_v8 = vsel %vm76_vm0, %v230_v7, 0  ;;  %v231_v9 = vld [vmem:[%s337_s1 + $0x20] sm:$0xff]   ;;  %v232_v11 = vld [vmem:[%s337_s1 + $0x28] sm:$0xff]   ;;  %v233_v13 = vld [vmem:[%s337_s1 + $0x30] sm:$0xff]  }
   0x7   :  { %v93_v10 = vsel %vm76_vm0, %v231_v9, 0  ;;  %v96_v12 = vsel %vm76_vm0, %v232_v11, 0  ;;  %v99_v14 = vsel %vm76_vm0, %v233_v13, 0  ;;  %v234_v15 = vld [vmem:[%s337_s1 + $0x38] sm:$0xff]   ;;  %v235_v17 = vld [vmem:[%s336_s0] sm:$0xff]   ;;  %s270_s0 = smov [#allocation2]  }
   0x8   :  { %v102_v16 = vsel %vm76_vm0, %v234_v15, 0  ;;  %s172_s1 = sshll.u32 %s270_s0, 4  ;;  %s173_s1 = int_to_ptr.vmem [resolvable:$true] %s172_s1 }
   0x9   :  { %s244_s27 = scalar_lea.vmem %s173_s1, 256  ;;  %p249_p1 = scmp.lt.s32.totalorder %s173_s1, %s173_s1 }
   0xa   :  { %p245_p0 = scmp.ne.s32.totalorder %s173_s1, %s244_s27  ;;  %p250_p2 = scmp.lt.s32.totalorder %s244_s27, %s244_s27 }
   0xb   :  { %205 = vmatpush3.bf16.xpose.msra.mxu0 %v84_v4 }
   0xc   :  { %206 = vmatprep.subr.bf16.mxu0 %v268_v1  ;;  %p251_p3 = por %p250_p2, %p249_p1 }
   0xe   :  { %p252_p4 = pnand %p251_p3, %p245_p0 }
  0x13   :  { %207 = vmatpush3.bf16.xpose.msra.mxu0 %v87_v6 }
  0x14   :  { %208 = vmatprep.subr.bf16.mxu0 %v268_v1 }
  0x1b   :  { %209 = vmatpush3.bf16.xpose.msra.mxu0 %v90_v8 }
  0x1c   :  { %210 = vmatprep.subr.bf16.mxu0 %v268_v1 }
  0x23   :  { %211 = vmatpush3.bf16.xpose.msra.mxu0 %v93_v10 }
  0x24   :  { %212 = vmatprep.subr.bf16.mxu0 %v268_v1 }
  0x2b   :  { %213 = vmatpush3.bf16.xpose.msra.mxu0 %v96_v12 }
  0x2c   :  { %214 = vmatprep.subr.bf16.mxu0 %v268_v1 }
  0x33   :  { %215 = vmatpush3.bf16.xpose.msra.mxu0 %v99_v14 }
  0x34   :  { %216 = vmatprep.subr.bf16.mxu0 %v268_v1 }
  0x3b   :  { %217 = vmatpush3.bf16.xpose.msra.mxu0 %v102_v16 }
  0x42   :  { %219 = vmatmul.mubr.msk.bf16.vlgmr.msra.gmra.mrb[0].mxu0 %vm76_vm0, %v235_v17 }
 0x115   :  { %v138_v18 = vpop.f32.mrb[0].mxu0 }
 0x116   :  { %145 = vmax.xlane.f32.xlu0 %v138_v18  ;;  %v220_v19 = vpop.f32.mrb[1].mxu0 }
 0x117   :  { %v141_v20 = vpop.f32.mrb[2].mxu0 }
 0x118   :  { %v221_v21 = vpop.f32.mrb[3].mxu0 }
 0x11a   :  { %147 = vmax.xlane.f32.xlu0 %v141_v20 }
 0x1a3   :  { %v146_v22 = vpop.xlane.xlu0 %145 }
 0x1a4   :  { %v149_v23 = vsub.f32 %v138_v18, %v146_v22 }
 0x1a6   :  { %v151_v24 = vmul.f32 1.442695, %v149_v23 }
 0x1a7   :  { %v148_v25 = vpop.xlane.xlu0 %147 }
 0x1a8   :  { %v150_v26 = vsub.f32 %v141_v20, %v148_v25  ;;  %236 = vpow2.f32 %v151_v24 }
 0x1aa   :  { %v153_v27 = vmul.f32 1.442695, %v150_v26 }
 0x1ac   :  { %238 = vpow2.f32 %v153_v27 }
 0x1b2   :  { %v237_v28 = vpop.eup %236 }
 0x1b3   :  { %155 = vadd.xlane.f32.xlu1 %v237_v28 }
 0x1b6   :  { %v239_v29 = vpop.eup %238 }
 0x1b7   :  { %157 = vadd.xlane.f32.xlu1 %v239_v29 }
 0x240   :  { %v156_v30 = vpop.xlane.xlu1 %155 }
 0x241   :  { %240 = vlog2.f32 %v156_v30 }
 0x244   :  { %v158_v31 = vpop.xlane.xlu1 %157 }
 0x245   :  { %242 = vlog2.f32 %v158_v31 }
 0x24b   :  { %v241_v32 = vpop.eup %240 }
 0x24c   :  { %v160_v33 = vmul.f32 0.6931472, %v241_v32 }
 0x24e   :  { %v163_v34 = vsub.f32 %v149_v23, %v160_v33 }
 0x24f   :  { %v243_v35 = vpop.eup %242 }
 0x250   :  { %165 = vst [vmem:[#allocation2] sm:$0xff] %v163_v34  ;;  %v162_v36 = vmul.f32 0.6931472, %v243_v35 }
 0x252   :  { %v164_v37 = vsub.f32 %v150_v26, %v162_v36 }
 0x254   :  { %166 = vst [vmem:[#allocation2 + $0x8] sm:$0xff] %v164_v37 }
 0x255   :  { %255 = shalt.err (!%p252_p4)
}
 0x256   :  { %s256_s30 = scalar_lea.hbm %s338_s2, 256 }
 0x257   :  { %p257_p5 = scmp.ne.s32.totalorder %s338_s2, %s256_s30  ;;  %p260_p6 = scmp.lt.u32.totalorder %s256_s30, %s338_s2 }
 0x259   :  { %p262_p7 = pnand %p260_p6, %p257_p5 }
 0x25b   :  { %265 = shalt.err (!%p262_p7)
}
 0x25c   :  { %s271_s7 = smov 128   ;;  %s272_s8 = smov 8  }
 0x25d   :  { %178 = dma.vmem_to_hbm [thread:$0]  %s173_s1, 256, %s338_s2, [#allocation3], %s271_s7, %s271_s7, %s272_s8  }
 0x25e   :  { %266 = dma.done.wait [#allocation3], 256  }
 0x25f   :  { %267 = vsyncadd [#allocation3], 4294967040 }
 0x260   :  { %182 = vsyncpa [#allocation3], 1 }

</bundles_post_ra>
